<compile_context>
chip_gen: v7x
topology: tpu7x:2x2x1
jax: 0.10.0
libtpu: 0.0.40
codegen_flags: <defaults>
</compile_context>

<pallas_src>
import functools
import math

import jax
import jax.numpy as jnp
from jax.experimental import pallas as pl
from jax.experimental.pallas import tpu as pltpu

_LANE = 128            # lane width of a vreg (last dim)
_SUBLANE = 8           # sublane height of a vreg (second-last dim)
_MAX_BATCH_TILE = 512  # bigger tiles amortize ~0.35us/grid-step overhead

# Fused-weights VMEM budget guard (conservative for v7x: 64 MiB physical,
# 32 MiB scoped default).
_FUSED_WEIGHT_BYTES_LIMIT = 40 << 20


def _round_up(v, m):
    return ((v + m - 1) // m) * m


def _cdiv(a, b):
    return -(-a // b)


# ---------------------------------------------------------------------------
# Fused MLP kernel: all layers in one kernel body, intermediates stay in VMEM
# ---------------------------------------------------------------------------
def _mlp_fused_kernel(*refs, acts):
    # refs = (x_ref, w0, b0, w1, b1, ..., w_{L-1}, b_{L-1}, o_ref)
    x_ref, o_ref = refs[0], refs[-1]
    h = x_ref[...].astype(jnp.float32)
    for i, act in enumerate(acts):
        w = refs[1 + 2 * i][...]          # [in_pad, out_pad], bf16 (or f32)
        b = refs[2 + 2 * i][...]          # [1, out_pad], f32
        # MXU matmul: dot operands in the (bf16) weight dtype, f32 accumulate.
        # Bias add + activation stay in f32 (VPU/EUP f32 path on all gens).
        h = jnp.dot(h.astype(w.dtype), w,
                    preferred_element_type=jnp.float32) + b
        if act == "tanh":
            h = jnp.tanh(h)               # EUP slot -> essentially free here
        elif act == "relu":
            h = jnp.maximum(h, 0.0)
        elif act == "identity":
            pass
        else:
            raise ValueError(f"unsupported activation: {act}")
    o_ref[...] = h.astype(o_ref.dtype)


# ---------------------------------------------------------------------------
# Parameter construction (plain JAX glue)
# ---------------------------------------------------------------------------
def init_mlp_params(key, layer_sizes):
    """Deterministic init mimicking nn.Linear default: U(-k, k), k=1/sqrt(in)."""
    params = []
    for i in range(len(layer_sizes) - 1):
        fan_in, fan_out = layer_sizes[i], layer_sizes[i + 1]
        key, kw, kb = jax.random.split(key, 3)
        bound = 1.0 / math.sqrt(fan_in)
        # stored pre-transposed: [in, out]
        w = jax.random.uniform(kw, (fan_in, fan_out), jnp.float32, -bound, bound)
        b = jax.random.uniform(kb, (1, fan_out), jnp.float32, -bound, bound)
        params.append((w, b))
    return params


def prepare_mlp_params(params, activation="tanh", output_activation="identity",
                       weight_dtype=jnp.bfloat16):
    """One-time padding + dtype cast of the MLP parameters.

    Runs ONCE (outside the per-step hot path).  Pads every feature dim to a
    multiple of 128 lanes (value-preserving zero padding), casts weights to
    `weight_dtype` (bf16 by default for the MXU fast path) and keeps biases in
    f32 for the f32 accumulator add.
    """
    n = len(params)
    dims = [params[0][0].shape[0]] + [w.shape[1] for (w, _) in params]
    pdims = [_round_up(d, _LANE) for d in dims]

    padded_wb = []
    for i, (w, b) in enumerate(params):
        w_p = jnp.pad(w, ((0, pdims[i] - w.shape[0]),
                          (0, pdims[i + 1] - w.shape[1]))).astype(weight_dtype)
        b2 = jnp.reshape(b, (1, -1)).astype(jnp.float32)
        b_p = jnp.pad(b2, ((0, 0), (0, pdims[i + 1] - b2.shape[1])))
        padded_wb += [w_p, b_p]

    wb_bytes = int(sum(int(a.size) * a.dtype.itemsize for a in padded_wb))
    if 2 * wb_bytes > _FUSED_WEIGHT_BYTES_LIMIT:
        # TODO(synk): K/N-tiled per-layer fallback (pltpu.emit_pipeline + VMEM
        # f32 accumulator) for configs whose padded weights exceed v7x VMEM.
        raise NotImplementedError(
            "padded weight set too large for the fully-fused VMEM-resident "
            f"scheme ({wb_bytes} bytes); needs a K-tiled fallback.")

    acts = tuple(activation if i < n - 1 else output_activation
                 for i in range(n))
    return {
        "padded_wb": tuple(padded_wb),
        "dims": tuple(dims),
        "pdims": tuple(pdims),
        "acts": acts,
        "wb_bytes": wb_bytes,
    }


# ---------------------------------------------------------------------------
# Forward pass: one fused pallas_call for the whole MLP
# ---------------------------------------------------------------------------
def mlp_forward(prepared, x):
    """Equivalent of MLP.forward on pre-prepared (padded, cast) parameters."""
    padded_wb = prepared["padded_wb"]
    dims, pdims, acts = prepared["dims"], prepared["pdims"], prepared["acts"]
    wb_bytes = prepared["wb_bytes"]
    n = len(acts)

    B, in_dim = x.shape
    assert in_dim == dims[0], "input feature dim mismatch"
    out_dim = dims[-1]
    itemsize = jnp.dtype(x.dtype).itemsize

    # Batch tile: choose the smallest number of tiles of size <= _MAX_BATCH_TILE
    # and size each tile to fit B with minimal padding waste (sublane-rounded).
    # >=2 grid steps on large batches also lets v7x shard across its 2 TCs via
    # the "parallel" axis; tiny batches (grid=1) just run single-core.
    n_tiles = _cdiv(B, _MAX_BATCH_TILE)
    tb = _round_up(_cdiv(B, n_tiles), _SUBLANE)
    b_pad = _round_up(B, tb)

    # Only the activations are padded per call (parameters were prepared once).
    x_p = jnp.pad(x, ((0, b_pad - B), (0, pdims[0] - in_dim)))

    kernel = functools.partial(_mlp_fused_kernel, acts=acts)

    in_specs = [pl.BlockSpec((tb, pdims[0]), lambda i: (i, 0))]
    for li in range(n):
        # Weights/biases: constant block index -> fetched once, VMEM-resident
        # across batch-grid iterations.
        in_specs.append(pl.BlockSpec((pdims[li], pdims[li + 1]),
                                     lambda i: (0, 0)))
        in_specs.append(pl.BlockSpec((1, pdims[li + 1]), lambda i: (0, 0)))

    # Explicit VMEM budget: weights/biases (x2 for buffering slack) +
    # double-buffered x/out tiles + live f32 intermediates, plus headroom.
    io_bytes = tb * (pdims[0] + pdims[-1]) * itemsize
    inter_bytes = 2 * tb * max(pdims) * 4
    vmem_limit = 2 * wb_bytes + 2 * io_bytes + inter_bytes + (2 << 20)
    vmem_limit = int(min(max(vmem_limit, 16 << 20), 64 << 20))

    # Advisory cost estimate so XLA schedules the pad/slice around the call.
    flops = 2 * b_pad * sum(pdims[i] * pdims[i + 1] for i in range(n))
    transcendentals = b_pad * sum(pdims[i + 1] for i in range(n)
                                  if acts[i] == "tanh")
    bytes_accessed = (b_pad * pdims[0] * itemsize
                      + b_pad * pdims[-1] * itemsize
                      + wb_bytes)

    out_p = pl.pallas_call(
        kernel,
        out_shape=jax.ShapeDtypeStruct((b_pad, pdims[-1]), x.dtype),
        grid=(b_pad // tb,),
        in_specs=in_specs,
        out_specs=pl.BlockSpec((tb, pdims[-1]), lambda i: (i, 0)),
        compiler_params=pltpu.CompilerParams(
            dimension_semantics=("parallel",),
            vmem_limit_bytes=vmem_limit),
        cost_estimate=pl.CostEstimate(flops=flops,
                                      transcendentals=transcendentals,
                                      bytes_accessed=bytes_accessed),
    )(x_p, *padded_wb)

    return out_p[:B, :out_dim]


# ---------------------------------------------------------------------------
# Pure-JAX references for correctness checking
# ---------------------------------------------------------------------------
def mlp_forward_ref(params, x, activation="tanh", output_activation="identity",
                    weight_dtype=jnp.float32):
    """Reference matching the kernel's numerics when weight_dtype == bf16."""
    n = len(params)
    h = x.astype(jnp.float32)
    for i, (w, b) in enumerate(params):
        h = jnp.dot(h.astype(weight_dtype), w.astype(weight_dtype),
                    preferred_element_type=jnp.float32)
        h = h + jnp.reshape(b, (1, -1)).astype(jnp.float32)
        act = activation if i < n - 1 else output_activation
        if act == "tanh":
            h = jnp.tanh(h)
        elif act == "relu":
            h = jnp.maximum(h, 0.0)
    return h


if __name__ == "__main__":
    # BipedalWalker-ish small config: obs_dim=24 -> 32 -> 32 -> act_dim=4
    layer_sizes = [24, 32, 32, 4]
    batch = 2

    key = jax.random.PRNGKey(0)
    key_x, key_p = jax.random.split(key)
    x = jax.random.normal(key_x, (batch, layer_sizes[0]), jnp.float32)
    params = init_mlp_params(key_p, layer_sizes)

    # activation_func=nn.Tanh, output_activation_func=nn.Identity
    prepared = prepare_mlp_params(params, activation="tanh",
                                  output_activation="identity",
                                  weight_dtype=jnp.bfloat16)
    out = mlp_forward(prepared, x)
    out = jax.block_until_ready(out)

    # Matched-precision reference (bf16 dot operands, f32 accumulate/elementwise)
    ref_bf16 = mlp_forward_ref(params, x, "tanh", "identity",
                               weight_dtype=jnp.bfloat16)
    # Full-f32 reference: sanity bound on the bf16 weight quantization error
    ref_f32 = mlp_forward_ref(params, x, "tanh", "identity",
                              weight_dtype=jnp.float32)

    assert out.shape == (batch, layer_sizes[-1])
    assert jnp.allclose(out, ref_bf16, atol=1e-4, rtol=1e-4), \
        "mismatch vs matched-precision reference"
    assert jnp.allclose(out, ref_f32, atol=5e-2, rtol=5e-2), \
        "bf16 weight quantization error too large vs f32 reference"

    print("KERNEL_OK")
</pallas_src>

<mosaic_0001>
module attributes {stable_mosaic.version = 11 : i64} {
  func.func @_mlp_fused_kernel(%arg0: i32, %arg1: memref<8x128xf32, #tpu.memory_space<vmem>>, %arg2: memref<128x128xbf16, #tpu.memory_space<vmem>>, %arg3: memref<1x128xf32, #tpu.memory_space<vmem>>, %arg4: memref<128x128xbf16, #tpu.memory_space<vmem>>, %arg5: memref<1x128xf32, #tpu.memory_space<vmem>>, %arg6: memref<128x128xbf16, #tpu.memory_space<vmem>>, %arg7: memref<1x128xf32, #tpu.memory_space<vmem>>, %arg8: memref<8x128xf32, #tpu.memory_space<vmem>>) attributes {dimension_semantics = [#tpu.dimension_semantics<parallel>], iteration_bounds = array<i64: 1>, scalar_prefetch = 0 : i64, scratch_operands = 0 : i64, tpu.core_type = #tpu.core_type<tc>, window_params = [{transform_indices = @transform_0, window_bounds = array<i64: 8, 128>}, {pipeline_mode = #tpu.pipeline_mode<synchronous>, transform_indices = @transform_1, window_bounds = array<i64: 128, 128>}, {pipeline_mode = #tpu.pipeline_mode<synchronous>, transform_indices = @transform_2, window_bounds = array<i64: 1, 128>}, {pipeline_mode = #tpu.pipeline_mode<synchronous>, transform_indices = @transform_3, window_bounds = array<i64: 128, 128>}, {pipeline_mode = #tpu.pipeline_mode<synchronous>, transform_indices = @transform_4, window_bounds = array<i64: 1, 128>}, {pipeline_mode = #tpu.pipeline_mode<synchronous>, transform_indices = @transform_5, window_bounds = array<i64: 128, 128>}, {pipeline_mode = #tpu.pipeline_mode<synchronous>, transform_indices = @transform_6, window_bounds = array<i64: 1, 128>}, {transform_indices = @transform_7, window_bounds = array<i64: 8, 128>}]} {
    %c0 = arith.constant 0 : index
    %c0_0 = arith.constant 0 : index
    %0 = vector.load %arg1[%c0, %c0_0] : memref<8x128xf32, #tpu.memory_space<vmem>>, vector<8x128xf32>
    %c0_1 = arith.constant 0 : index
    %c0_2 = arith.constant 0 : index
    %1 = vector.load %arg2[%c0_1, %c0_2] : memref<128x128xbf16, #tpu.memory_space<vmem>>, vector<128x128xbf16>
    %c0_3 = arith.constant 0 : index
    %c0_4 = arith.constant 0 : index
    %2 = vector.load %arg3[%c0_3, %c0_4] : memref<1x128xf32, #tpu.memory_space<vmem>>, vector<1x128xf32>
    %3 = arith.truncf %0 : vector<8x128xf32> to vector<8x128xbf16>
    %cst = arith.constant dense<0.000000e+00> : vector<8x128xf32>
    %4 = tpu.matmul %3, %1, %cst {dimension_numbers = #tpu.dot_dimension_numbers<[1], [0], [0], [1], [0, 0, 1, 1], [], []>} : vector<8x128xbf16>, vector<128x128xbf16>, vector<8x128xf32> -> vector<8x128xf32>
    %5 = vector.broadcast %2 : vector<1x128xf32> to vector<8x128xf32>
    %6 = arith.addf %4, %5 : vector<8x128xf32>
    %7 = math.tanh %6 : vector<8x128xf32>
    %c0_5 = arith.constant 0 : index
    %c0_6 = arith.constant 0 : index
    %8 = vector.load %arg4[%c0_5, %c0_6] : memref<128x128xbf16, #tpu.memory_space<vmem>>, vector<128x128xbf16>
    %c0_7 = arith.constant 0 : index
    %c0_8 = arith.constant 0 : index
    %9 = vector.load %arg5[%c0_7, %c0_8] : memref<1x128xf32, #tpu.memory_space<vmem>>, vector<1x128xf32>
    %10 = arith.truncf %7 : vector<8x128xf32> to vector<8x128xbf16>
    %cst_9 = arith.constant dense<0.000000e+00> : vector<8x128xf32>
    %11 = tpu.matmul %10, %8, %cst_9 {dimension_numbers = #tpu.dot_dimension_numbers<[1], [0], [0], [1], [0, 0, 1, 1], [], []>} : vector<8x128xbf16>, vector<128x128xbf16>, vector<8x128xf32> -> vector<8x128xf32>
    %12 = vector.broadcast %9 : vector<1x128xf32> to vector<8x128xf32>
    %13 = arith.addf %11, %12 : vector<8x128xf32>
    %14 = math.tanh %13 : vector<8x128xf32>
    %c0_10 = arith.constant 0 : index
    %c0_11 = arith.constant 0 : index
    %15 = vector.load %arg6[%c0_10, %c0_11] : memref<128x128xbf16, #tpu.memory_space<vmem>>, vector<128x128xbf16>
    %c0_12 = arith.constant 0 : index
    %c0_13 = arith.constant 0 : index
    %16 = vector.load %arg7[%c0_12, %c0_13] : memref<1x128xf32, #tpu.memory_space<vmem>>, vector<1x128xf32>
    %17 = arith.truncf %14 : vector<8x128xf32> to vector<8x128xbf16>
    %cst_14 = arith.constant dense<0.000000e+00> : vector<8x128xf32>
    %18 = tpu.matmul %17, %15, %cst_14 {dimension_numbers = #tpu.dot_dimension_numbers<[1], [0], [0], [1], [0, 0, 1, 1], [], []>} : vector<8x128xbf16>, vector<128x128xbf16>, vector<8x128xf32> -> vector<8x128xf32>
    %19 = vector.broadcast %16 : vector<1x128xf32> to vector<8x128xf32>
    %20 = arith.addf %18, %19 : vector<8x128xf32>
    %c0_15 = arith.constant 0 : index
    %c0_16 = arith.constant 0 : index
    %21 = vector.load %arg8[%c0_15, %c0_16] : memref<8x128xf32, #tpu.memory_space<vmem>>, vector<8x128xf32>
    tpu.vector_store %arg8[%c0_15, %c0_16], %20 {strides = array<i32>} : memref<8x128xf32, #tpu.memory_space<vmem>>, vector<8x128xf32>,
    return
  }
  func.func @transform_0(%arg0: i32) -> (i32, i32) {
    %c0_i32 = arith.constant 0 : i32
    %c0_i32_0 = arith.constant 0 : i32
    return %arg0, %c0_i32 : i32, i32
  }
  func.func @transform_1(%arg0: i32) -> (i32, i32) {
    %c0_i32 = arith.constant 0 : i32
    %c0_i32_0 = arith.constant 0 : i32
    %c0_i32_1 = arith.constant 0 : i32
    return %c0_i32, %c0_i32_0 : i32, i32
  }
  func.func @transform_2(%arg0: i32) -> (i32, i32) {
    %c0_i32 = arith.constant 0 : i32
    %c0_i32_0 = arith.constant 0 : i32
    %c0_i32_1 = arith.constant 0 : i32
    return %c0_i32, %c0_i32_0 : i32, i32
  }
  func.func @transform_3(%arg0: i32) -> (i32, i32) {
    %c0_i32 = arith.constant 0 : i32
    %c0_i32_0 = arith.constant 0 : i32
    %c0_i32_1 = arith.constant 0 : i32
    return %c0_i32, %c0_i32_0 : i32, i32
  }
  func.func @transform_4(%arg0: i32) -> (i32, i32) {
    %c0_i32 = arith.constant 0 : i32
    %c0_i32_0 = arith.constant 0 : i32
    %c0_i32_1 = arith.constant 0 : i32
    return %c0_i32, %c0_i32_0 : i32, i32
  }
  func.func @transform_5(%arg0: i32) -> (i32, i32) {
    %c0_i32 = arith.constant 0 : i32
    %c0_i32_0 = arith.constant 0 : i32
    %c0_i32_1 = arith.constant 0 : i32
    return %c0_i32, %c0_i32_0 : i32, i32
  }
  func.func @transform_6(%arg0: i32) -> (i32, i32) {
    %c0_i32 = arith.constant 0 : i32
    %c0_i32_0 = arith.constant 0 : i32
    %c0_i32_1 = arith.constant 0 : i32
    return %c0_i32, %c0_i32_0 : i32, i32
  }
  func.func @transform_7(%arg0: i32) -> (i32, i32) {
    %c0_i32 = arith.constant 0 : i32
    %c0_i32_0 = arith.constant 0 : i32
    return %arg0, %c0_i32 : i32, i32
  }
}

</mosaic_0001>

<bundles_post_ra>
// kernel: tpu_custom_call.1
= control target key start
LH: loop header
LB: loop body
LE: loop exit
PB: predicated region body
PF: predicated region fallthrough
CT: control target
= control target key end

     0   :  { %12 = vsyncpa [#allocation3], 0  ;;  %s864_s0 = inlined_call_operand.hbm [shape: f32[8,128], index: 0, kind: input, shape index: {}]   ;;  %s865_s1 = inlined_call_operand.hbm [shape: bf16[128,128], index: 1, kind: input, shape index: {}]   ;;  %s866_s2 = inlined_call_operand.vmem [shape: f32[1,128], index: 2, kind: input, shape index: {}]   ;;  %s867_s3 = inlined_call_operand.hbm [shape: bf16[128,128], index: 3, kind: input, shape index: {}]   ;;  %s868_s4 = inlined_call_operand.vmem [shape: f32[1,128], index: 4, kind: input, shape index: {}]   ;;  %s869_s5 = inlined_call_operand.hbm [shape: bf16[128,128], index: 5, kind: input, shape index: {}]   ;;  %s870_s6 = inlined_call_operand.vmem [shape: f32[1,128], index: 6, kind: input, shape index: {}]   ;;  %s871_s7 = inlined_call_operand.hbm [shape: f32[8,128], index: 7, kind: output, shape index: {}]  }
   0x1   :  { %13 = vsyncpa [#allocation6], 0 }
   0x2   :  { %14 = vsyncpa [#allocation9], 0 }
   0x3   :  { %15 = vsyncpa [#allocation4], 0  ;;  %s707_s24 = smov [#allocation5]   ;;  %s589_s28 = scalar_lea.hbm %s865_s1, 1024 }
   0x4   :  { %s31_s25 = sshll.u32 %s707_s24, 4  ;;  %p590_p0 = scmp.ne.s32.totalorder %s865_s1, %s589_s28  ;;  %s32_s25 = int_to_ptr.vmem [resolvable:$true] %s31_s25 }
   0x5   :  { %p593_p1 = scmp.lt.u32.totalorder %s589_s28, %s865_s1 }
   0x7   :  { %p595_p2 = pnand %p593_p1, %p590_p0 }
   0x9   :  { %598 = shalt.err (!%p595_p2)
}
   0xa   :  { %s599_s10 = scalar_lea.vmem %s32_s25, 1024  ;;  %p604_p4 = scmp.lt.s32.totalorder %s32_s25, %s32_s25 }
   0xb   :  { %p600_p3 = scmp.ne.s32.totalorder %s32_s25, %s599_s10  ;;  %p605_p5 = scmp.lt.s32.totalorder %s599_s10, %s599_s10 }
   0xd   :  { %p606_p6 = por %p605_p5, %p604_p4 }
   0xf   :  { %p607_p7 = pnand %p606_p6, %p600_p3 }
  0x11   :  { %610 = shalt.err (!%p607_p7)
}
  0x12   :  { %s708_s11 = smov 64   ;;  %s709_s12 = smov 4  }
  0x13   :  { %37 = dma.hbm_to_vmem [thread:$0]  %s865_s1, 1024, %s32_s25, [#allocation6], %s708_s11, %s708_s11, %s709_s12  }
  0x14   :  { %s710_s15 = smov [#allocation2]   ;;  %s711_s17 = smov [#allocation7]  }
  0x15   :  { %s22_s16 = sshll.u32 %s710_s15, 4  ;;  %s45_s18 = sshll.u32 %s711_s17, 4  ;;  %s23_s16 = int_to_ptr.vmem [resolvable:$true] %s22_s16  ;;  %s46_s18 = int_to_ptr.vmem [resolvable:$true] %s45_s18 }
  0x16   :  { %s611_s21 = scalar_lea.hbm %s864_s0, 128 }
  0x17   :  { %p612_p8 = scmp.ne.s32.totalorder %s864_s0, %s611_s21  ;;  %p615_p9 = scmp.lt.u32.totalorder %s611_s21, %s864_s0 }
  0x19   :  { %p617_p10 = pnand %p615_p9, %p612_p8 }
  0x1b   :  { %620 = shalt.err (!%p617_p10)
}
  0x1c   :  { %s621_s1 = scalar_lea.vmem %s23_s16, 128  ;;  %p626_p12 = scmp.lt.s32.totalorder %s23_s16, %s23_s16 }
  0x1d   :  { %p622_p11 = scmp.ne.s32.totalorder %s23_s16, %s621_s1  ;;  %p627_p13 = scmp.lt.s32.totalorder %s621_s1, %s621_s1 }
  0x1f   :  { %p628_p0 = por %p627_p13, %p626_p12 }
  0x21   :  { %p629_p1 = pnand %p628_p0, %p622_p11 }
  0x23   :  { %632 = shalt.err (!%p629_p1)
}
  0x24   :  { %25 = dma.hbm_to_vmem [thread:$0]  %s864_s0, 128, %s23_s16, [#allocation3]  }
  0x25   :  { %s633_s30 = scalar_lea.hbm %s867_s3, 1024 }
  0x26   :  { %p634_p2 = scmp.ne.s32.totalorder %s867_s3, %s633_s30  ;;  %p637_p3 = scmp.lt.u32.totalorder %s633_s30, %s867_s3 }
  0x28   :  { %p639_p4 = pnand %p637_p3, %p634_p2 }
  0x2a   :  { %642 = shalt.err (!%p639_p4)
}
  0x2b   :  { %s643_s14 = scalar_lea.vmem %s46_s18, 1024  ;;  %p648_p6 = scmp.lt.s32.totalorder %s46_s18, %s46_s18 }
  0x2c   :  { %p644_p5 = scmp.ne.s32.totalorder %s46_s18, %s643_s14  ;;  %p649_p7 = scmp.lt.s32.totalorder %s643_s14, %s643_s14 }
  0x2e   :  { %p650_p8 = por %p649_p7, %p648_p6 }
  0x30   :  { %p651_p9 = pnand %p650_p8, %p644_p5 }
  0x32   :  { %654 = shalt.err (!%p651_p9)
}
  0x33   :  { %51 = dma.hbm_to_vmem [thread:$0]  %s867_s3, 1024, %s46_s18, [#allocation6], %s708_s11, %s708_s11, %s709_s12  }
  0x34   :  { %s712_s16 = smov [#allocation8]   ;;  %s655_s21 = scalar_lea.hbm %s869_s5, 1024 }
  0x35   :  { %s59_s17 = sshll.u32 %s712_s16, 4  ;;  %p656_p10 = scmp.ne.s32.totalorder %s869_s5, %s655_s21  ;;  %s60_s17 = int_to_ptr.vmem [resolvable:$true] %s59_s17 }
  0x36   :  { %p659_p11 = scmp.lt.u32.totalorder %s655_s21, %s869_s5 }
  0x38   :  { %p661_p12 = pnand %p659_p11, %p656_p10 }
  0x3a   :  { %664 = shalt.err (!%p661_p12)
}
  0x3b   :  { %s665_s1 = scalar_lea.vmem %s60_s17, 1024  ;;  %p670_p0 = scmp.lt.s32.totalorder %s60_s17, %s60_s17 }
  0x3c   :  { %p666_p13 = scmp.ne.s32.totalorder %s60_s17, %s665_s1  ;;  %p671_p1 = scmp.lt.s32.totalorder %s665_s1, %s665_s1 }
  0x3e   :  { %p672_p2 = por %p671_p1, %p670_p0 }
  0x40   :  { %p673_p3 = pnand %p672_p2, %p666_p13 }
  0x42   :  { %676 = shalt.err (!%p673_p3)
}
  0x43   :  { %65 = dma.hbm_to_vmem [thread:$0]  %s869_s5, 1024, %s60_s17, [#allocation9], %s708_s11, %s708_s11, %s709_s12  }
  0x44   :  { %699 = dma.done.wait [#allocation3], 128  }
  0x45   :  { %700 = vsyncadd [#allocation3], 4294967168 }
  0x46   :  { %701 = dma.done.wait [#allocation6], 2048  }
  0x47   :  { %702 = vsyncadd [#allocation6], 4294965248 }
  0x48   :  { %703 = dma.done.wait [#allocation9], 1024  }
  0x49   :  { %704 = vsyncadd [#allocation9], 4294966272  ;;  %v713_v0 = vmov 0.0   ;;  %vm714_vm0 = vmmov 0   ;;  %v561_v1 = vld [vmem:[#allocation5] sm:$0xff]   ;;  %v562_v2 = vld [vmem:[#allocation5 + $0x8] sm:$0xff]  }
  0x4a   :  { %492 = vmatprep.subr.bf16.mxu0 %v713_v0  ;;  %508 = vmatprep.mubr.msk.bf16.mxu0 %vm714_vm0, %v713_v0  ;;  %v563_v3 = vld [vmem:[#allocation5 + $0x10] sm:$0xff]   ;;  %v569_v4 = vld [vmem:[#allocation7] sm:$0xff]   ;;  %v564_v5 = vld [vmem:[#allocation5 + $0x18] sm:$0xff]   ;;  %s715_s28 = smov [#allocation10]  }
  0x4b   :  { %512 = vmatprep.subr.bf16.mxu1 %v713_v0  ;;  %528 = vmatprep.mubr.msk.bf16.mxu1 %vm714_vm0, %v713_v0  ;;  %v570_v6 = vld [vmem:[#allocation7 + $0x8] sm:$0xff]   ;;  %v565_v7 = vld [vmem:[#allocation5 + $0x20] sm:$0xff]   ;;  %v571_v8 = vld [vmem:[#allocation7 + $0x10] sm:$0xff]   ;;  %s427_s29 = sshll.u32 %s715_s28, 4  ;;  %s428_s29 = int_to_ptr.vmem [resolvable:$true] %s427_s29 }
  0x4c   :  { %493 = vmatpush3.bf16.msra.mxu0 %v561_v1  ;;  %513 = vmatpush3.bf16.msra.mxu1 %v569_v4  ;;  %v566_v9 = vld [vmem:[#allocation5 + $0x28] sm:$0xff]   ;;  %v572_v10 = vld [vmem:[#allocation7 + $0x18] sm:$0xff]   ;;  %v567_v11 = vld [vmem:[#allocation5 + $0x30] sm:$0xff]   ;;  %p682_p5 = scmp.lt.s32.totalorder %s428_s29, %s428_s29 }
  0x4d   :  { %494 = vmatprep.subr.bf16.mxu0 %v713_v0  ;;  %514 = vmatprep.subr.bf16.mxu1 %v713_v0  ;;  %v568_v12 = vld [vmem:[#allocation5 + $0x38] sm:$0xff]   ;;  %v573_v15 = vld [vmem:[#allocation7 + $0x20] sm:$0xff]   ;;  %v574_v16 = vld [vmem:[#allocation7 + $0x28] sm:$0xff]  }
  0x4e   :  { %v81_v13 = vld [vmem:[#allocation2] sm:$0xff]  ;;  %v575_v17 = vld [vmem:[#allocation7 + $0x30] sm:$0xff]   ;;  %v577_v19 = vld [vmem:[#allocation8] sm:$0xff]  }
  0x4f   :  { %v99_v14 = vpack.c.bf16 %v81_v13, %v81_v13  ;;  %v576_v18 = vld [vmem:[#allocation7 + $0x38] sm:$0xff]   ;;  %v578_v20 = vld [vmem:[#allocation8 + $0x8] sm:$0xff]   ;;  %v579_v21 = vld [vmem:[#allocation8 + $0x10] sm:$0xff]  }
  0x50   :  { %495 = vmatpush3.bf16.msra.mxu0 %v562_v2  ;;  %515 = vmatpush3.bf16.msra.mxu1 %v570_v6  ;;  %v580_v22 = vld [vmem:[#allocation8 + $0x18] sm:$0xff]   ;;  %v581_v31 = vld [vmem:[#allocation8 + $0x20] sm:$0xff]   ;;  %v582_v32 = vld [vmem:[#allocation8 + $0x28] sm:$0xff]  }
  0x51   :  { %496 = vmatprep.subr.bf16.mxu0 %v713_v0  ;;  %516 = vmatprep.subr.bf16.mxu1 %v713_v0  ;;  %v438_v23 = vld [vmem:[%s866_s2] ss:$0 sm:$0xff]  ;;  %v583_v33 = vld [vmem:[#allocation8 + $0x30] sm:$0xff]  }
  0x52   :  { %v584_v34 = vld [vmem:[#allocation8 + $0x38] sm:$0xff]  }
  0x53   :  { %v447_v35 = vld [vmem:[%s868_s4] ss:$0 sm:$0xff]  ;;  %s677_s4 = scalar_lea.vmem %s428_s29, 128 }
  0x54   :  { %497 = vmatpush3.bf16.msra.mxu0 %v563_v3  ;;  %517 = vmatpush3.bf16.msra.mxu1 %v571_v8  ;;  %v456_v43 = vld [vmem:[%s870_s6] ss:$0 sm:$0xff]  ;;  %p678_p4 = scmp.ne.s32.totalorder %s428_s29, %s677_s4  ;;  %p683_p6 = scmp.lt.s32.totalorder %s677_s4, %s677_s4 }
  0x55   :  { %498 = vmatprep.subr.bf16.mxu0 %v713_v0  ;;  %518 = vmatprep.subr.bf16.mxu1 %v713_v0 }
  0x56   :  { %p684_p7 = por %p683_p6, %p682_p5 }
  0x58   :  { %499 = vmatpush3.bf16.msra.mxu0 %v564_v5  ;;  %519 = vmatpush3.bf16.msra.mxu1 %v572_v10  ;;  %p685_p8 = pnand %p684_p7, %p678_p4 }
  0x59   :  { %500 = vmatprep.subr.bf16.mxu0 %v713_v0  ;;  %520 = vmatprep.subr.bf16.mxu1 %v713_v0 }
  0x5c   :  { %501 = vmatpush3.bf16.msra.mxu0 %v565_v7  ;;  %521 = vmatpush3.bf16.msra.mxu1 %v573_v15 }
  0x5d   :  { %502 = vmatprep.subr.bf16.mxu0 %v713_v0  ;;  %522 = vmatprep.subr.bf16.mxu1 %v713_v0 }
  0x60   :  { %503 = vmatpush3.bf16.msra.mxu0 %v566_v9  ;;  %523 = vmatpush3.bf16.msra.mxu1 %v574_v16 }
  0x61   :  { %504 = vmatprep.subr.bf16.mxu0 %v713_v0  ;;  %524 = vmatprep.subr.bf16.mxu1 %v713_v0 }
  0x64   :  { %505 = vmatpush3.bf16.msra.mxu0 %v567_v11  ;;  %525 = vmatpush3.bf16.msra.mxu1 %v575_v17 }
  0x65   :  { %506 = vmatprep.subr.bf16.mxu0 %v713_v0  ;;  %526 = vmatprep.subr.bf16.mxu1 %v713_v0 }
  0x68   :  { %507 = vmatpush3.bf16.msra.mxu0 %v568_v12  ;;  %527 = vmatpush3.bf16.msra.mxu1 %v576_v18 }
  0x69   :  { %532 = vmatprep.subr.bf16.mxu0 %v713_v0 }
  0x6b   :  { %509 = vmatmul.mubr.bf16.vlgmr.msra.gmra.mrb[0].mxu0 %v99_v14 }
  0x6c   :  { %548 = vmatprep.mubr.msk.bf16.mxu0 %vm714_vm0, %v713_v0  ;;  %533 = vmatpush3.bf16.msra.mxu0 %v577_v19 }
  0x6d   :  { %534 = vmatprep.subr.bf16.mxu0 %v713_v0 }
  0x70   :  { %535 = vmatpush3.bf16.msra.mxu0 %v578_v20 }
  0x71   :  { %536 = vmatprep.subr.bf16.mxu0 %v713_v0 }
  0x74   :  { %537 = vmatpush3.bf16.msra.mxu0 %v579_v21 }
  0x75   :  { %538 = vmatprep.subr.bf16.mxu0 %v713_v0 }
  0x78   :  { %539 = vmatpush3.bf16.msra.mxu0 %v580_v22 }
  0x79   :  { %540 = vmatprep.subr.bf16.mxu0 %v713_v0 }
  0x7c   :  { %541 = vmatpush3.bf16.msra.mxu0 %v581_v31 }
  0x7d   :  { %542 = vmatprep.subr.bf16.mxu0 %v713_v0 }
  0x80   :  { %543 = vmatpush3.bf16.msra.mxu0 %v582_v32 }
  0x81   :  { %544 = vmatprep.subr.bf16.mxu0 %v713_v0 }
  0x84   :  { %545 = vmatpush3.bf16.msra.mxu0 %v583_v33 }
  0x85   :  { %546 = vmatprep.subr.bf16.mxu0 %v713_v0 }
  0x88   :  { %547 = vmatpush3.bf16.msra.mxu0 %v584_v34 }
 0x13e   :  { %v188_v24 = vpop.f32.mrb[0].mxu0 }
 0x13f   :  { %v189_v25 = vadd.f32 %v438_v23, %v188_v24  ;;  %v510_v26 = vpop.f32.mrb[1].mxu0 }
 0x140   :  { %v191_v27 = vpop.f32.mrb[2].mxu0 }
 0x141   :  { %585 = vtanh.f32 %v189_v25  ;;  %v511_v28 = vpop.f32.mrb[3].mxu0 }
 0x14b   :  { %v586_v29 = vpop.eup %585 }
 0x14c   :  { %v212_v30 = vpack.c.bf16 %v586_v29, %v586_v29 }
 0x14e   :  { %529 = vmatmul.mubr.bf16.vlgmr.msra.gmra.mrb[0].mxu1 %v212_v30 }
 0x221   :  { %v301_v36 = vpop.f32.mrb[0].mxu1 }
 0x222   :  { %v302_v37 = vadd.f32 %v447_v35, %v301_v36  ;;  %v530_v38 = vpop.f32.mrb[1].mxu1 }
 0x223   :  { %v304_v39 = vpop.f32.mrb[2].mxu1 }
 0x224   :  { %587 = vtanh.f32 %v302_v37  ;;  %v531_v40 = vpop.f32.mrb[3].mxu1 }
 0x22e   :  { %v588_v41 = vpop.eup %587 }
 0x22f   :  { %v325_v42 = vpack.c.bf16 %v588_v41, %v588_v41 }
 0x231   :  { %549 = vmatmul.mubr.bf16.vlgmr.msra.gmra.mrb[4].mxu0 %v325_v42 }
 0x304   :  { %v414_v44 = vpop.f32.mrb[4].mxu0 }
 0x305   :  { %v415_v45 = vadd.f32 %v456_v43, %v414_v44  ;;  %v550_v46 = vpop.f32.mrb[5].mxu0 }
 0x306   :  { %v417_v47 = vpop.f32.mrb[6].mxu0 }
 0x307   :  { %420 = vst [vmem:[#allocation10] sm:$0xff] %v415_v45  ;;  %v551_v48 = vpop.f32.mrb[7].mxu0 }
 0x308   :  { %688 = shalt.err (!%p685_p8)
}
 0x309   :  { %s689_s6 = scalar_lea.hbm %s871_s7, 128 }
 0x30a   :  { %p690_p9 = scmp.ne.s32.totalorder %s871_s7, %s689_s6  ;;  %p693_p10 = scmp.lt.u32.totalorder %s689_s6, %s871_s7 }
 0x30c   :  { %p695_p11 = pnand %p693_p10, %p690_p9 }
 0x30e   :  { %698 = shalt.err (!%p695_p11)
}
 0x30f   :  { %430 = dma.vmem_to_hbm [thread:$0]  %s428_s29, 128, %s871_s7, [#allocation4]  }
 0x310   :  { %705 = dma.done.wait [#allocation4], 128  }
 0x311   :  { %706 = vsyncadd [#allocation4], 4294967168 }
 0x312   :  { %434 = vsyncpa [#allocation3], 1 }
 0x313   :  { %435 = vsyncpa [#allocation6], 1 }
 0x314   :  { %436 = vsyncpa [#allocation9], 1 }
 0x315   :  { %437 = vsyncpa [#allocation4], 1 }

</bundles_post_ra>
